<compile_context>
chip_gen: v7x
topology: tpu7x:2x2x1
jax: 0.10.0
libtpu: 0.0.40
codegen_flags: <defaults>
</compile_context>

<pallas_src>
import functools

import jax
import jax.numpy as jnp
from jax.experimental import pallas as pl
from jax.experimental.pallas import tpu as pltpu


# ---------------------------------------------------------------------------
# VMEM budget / tiling helpers
# ---------------------------------------------------------------------------

def _vmem_limit_bytes():
    """Scoped-VMEM limit: 64 MiB on 128-MiB-VMEM chips (v5e/v6e), else 32 MiB."""
    default = 32 * 1024 * 1024
    try:
        info = pltpu.get_tpu_info()
        cap = getattr(info, "vmem_capacity_bytes", None)
        if cap is None:
            return default
        if cap >= 100 * 1024 * 1024:          # v5e / v6e: 128 MiB physical VMEM
            return 64 * 1024 * 1024
        return 32 * 1024 * 1024               # v7x: 64 MiB physical -> stay conservative
    except Exception:
        return default


def _row_tile(R, cap_rows):
    """Legal sublane tile: multiple of 8 dividing R (or R itself), <= cap_rows best effort."""
    if R <= cap_rows:
        return R
    if R % 8 == 0:
        d = (min(cap_rows, R) // 8) * 8
        while d >= 8:
            if R % d == 0:
                return d
            d -= 8
        return 8
    # R not a multiple of 8: the only legal non-full tile sizes would need masking.
    # TODO(synk): pathological (huge, odd-R) shapes fall back to full-R rows.
    return R


def _lane_tile(HW, cap_lanes):
    """Legal lane tile: multiple of 128 dividing HW (or HW itself), <= cap_lanes."""
    if HW % 128 != 0 or HW <= cap_lanes:
        return HW
    d = (min(cap_lanes, HW) // 128) * 128
    while d >= 128:
        if HW % d == 0:
            return d
        d -= 128
    return 128


def _pick_tiles_2d(R, HW, budget_bytes, itemsize):
    """Pick a (TR, THW) tile of x viewed as (R, HW) under ~budget_bytes."""
    row_bytes = HW * itemsize
    full_rows_fit = (8 * row_bytes <= budget_bytes) or (R * row_bytes <= budget_bytes)
    if HW % 128 != 0 or full_rows_fit:
        # Keep full-HW rows (one contiguous DMA row each); tile only the row axis.
        cap_rows = max(1, budget_bytes // max(row_bytes, 1))
        return _row_tile(R, cap_rows), HW
    # HW is a multiple of 128 and full rows blow the budget: tile the lane axis too.
    thw = _lane_tile(HW, max(128, budget_bytes // (8 * itemsize)))
    cap_rows = max(1, budget_bytes // (thw * itemsize))
    return _row_tile(R, cap_rows), thw


# ---------------------------------------------------------------------------
# Kernels
# ---------------------------------------------------------------------------

def _bn_fused_kernel(x_ref, gamma_ref, beta_ref, y_ref, mean_ref, var_ref,
                     *, inv_m, eps):
    """Single-pass stats + normalize for VMEM-resident activations.

    x_ref/y_ref: (N, C, HW); gamma/beta/mean/var: (C, 1) f32.
    """
    x = x_ref[...].astype(jnp.float32)             # (N, C, HW)
    xs = jnp.sum(x, axis=0)                        # (C, HW)  cross-vreg adds
    xq = jnp.sum(x * x, axis=0)                    # (C, HW)
    s = jnp.sum(xs, axis=1, keepdims=True)         # (C, 1)   lane reduce
    q = jnp.sum(xq, axis=1, keepdims=True)         # (C, 1)

    mean = s * inv_m
    var = jnp.maximum(q * inv_m - mean * mean, 0.0)          # biased (correction=0)
    scale = gamma_ref[...] * jax.lax.rsqrt(var + eps)
    bias = beta_ref[...] - mean * scale

    y_ref[...] = (x * scale[None] + bias[None]).astype(y_ref.dtype)
    mean_ref[...] = mean
    var_ref[...] = var


def _bn_rowstats_kernel(x_ref, rsum_ref, rsq_ref):
    """Pass 1: per-row (= per (n, c)) sum / sum-of-squares partials.

    x_ref: (TR, THW); rsum/rsq: (TR, 1) f32, accumulated over the lane grid axis.
    """
    x = x_ref[...].astype(jnp.float32)
    s = jnp.sum(x, axis=1, keepdims=True)
    q = jnp.sum(x * x, axis=1, keepdims=True)

    @pl.when(pl.program_id(1) == 0)
    def _():
        rsum_ref[...] = s
        rsq_ref[...] = q

    @pl.when(pl.program_id(1) != 0)
    def _():
        rsum_ref[...] += s
        rsq_ref[...] += q


def _bn_apply_kernel(x_ref, scale_ref, bias_ref, y_ref):
    """Pass 2: y = x * scale + bias.  x/y: (TR, THW); scale/bias: (TR, 1)."""
    x = x_ref[...].astype(jnp.float32)
    y_ref[...] = (x * scale_ref[...] + bias_ref[...]).astype(y_ref.dtype)


# ---------------------------------------------------------------------------
# pallas_call wrappers
# ---------------------------------------------------------------------------

def _row_stats(x2, R, HW, budget, vmem_limit):
    itemsize = jnp.dtype(x2.dtype).itemsize
    TR, THW = _pick_tiles_2d(R, HW, budget, itemsize)
    grid = (R // TR, HW // THW)
    return pl.pallas_call(
        _bn_rowstats_kernel,
        out_shape=(jax.ShapeDtypeStruct((R, 1), jnp.float32),
                   jax.ShapeDtypeStruct((R, 1), jnp.float32)),
        grid_spec=pltpu.PrefetchScalarGridSpec(
            num_scalar_prefetch=0,
            grid=grid,
            in_specs=[pl.BlockSpec((TR, THW), lambda ri, hi: (ri, hi))],
            out_specs=(pl.BlockSpec((TR, 1), lambda ri, hi: (ri, 0)),
                       pl.BlockSpec((TR, 1), lambda ri, hi: (ri, 0))),
        ),
        compiler_params=pltpu.CompilerParams(
            dimension_semantics=("parallel", "arbitrary"),
            vmem_limit_bytes=vmem_limit,
        ),
    )(x2)


def _apply_rows(x2, scale_rows, bias_rows, R, HW, budget, vmem_limit, out_dtype):
    itemsize = jnp.dtype(x2.dtype).itemsize
    TR, THW = _pick_tiles_2d(R, HW, budget, itemsize)
    grid = (R // TR, HW // THW)
    return pl.pallas_call(
        _bn_apply_kernel,
        out_shape=jax.ShapeDtypeStruct((R, HW), out_dtype),
        grid_spec=pltpu.PrefetchScalarGridSpec(
            num_scalar_prefetch=0,
            grid=grid,
            in_specs=[pl.BlockSpec((TR, THW), lambda ri, hi: (ri, hi)),
                      pl.BlockSpec((TR, 1), lambda ri, hi: (ri, 0)),
                      pl.BlockSpec((TR, 1), lambda ri, hi: (ri, 0))],
            out_specs=pl.BlockSpec((TR, THW), lambda ri, hi: (ri, hi)),
        ),
        compiler_params=pltpu.CompilerParams(
            dimension_semantics=("parallel", "parallel"),
            vmem_limit_bytes=vmem_limit,
        ),
    )(x2, scale_rows, bias_rows)


# ---------------------------------------------------------------------------
# Public forward
# ---------------------------------------------------------------------------

def batchnorm2d_forward(x, gamma, beta, running_mean, running_var,
                        eps=1e-5, momentum=0.1, training=True,
                        _force_tiled=False, _stats_budget=None, _apply_budget=None):
    """BatchNorm2d forward matching the reference module's semantics.

    x: (N, C, H, W).  Returns (y, new_running_mean, new_running_var).
    The trailing underscore args are internal test hooks for tile selection.
    """
    N, C, H, W = x.shape
    HW = H * W
    R = N * C
    M = N * HW
    eps = float(eps)

    vmem_limit = _vmem_limit_bytes()
    apply_budget = _apply_budget or min(vmem_limit // 5, 8 * 1024 * 1024)

    gamma_f = gamma.astype(jnp.float32).reshape(C)
    beta_f = beta.astype(jnp.float32).reshape(C)

    if training:
        x_bytes_f32 = 4 * N * C * HW
        fused_ok = (not _force_tiled) and (5 * x_bytes_f32 + (2 << 20) <= vmem_limit)

        if fused_ok:
            # Fused single-kernel path: 1 read + 1 write of x.
            x3 = x.reshape(N, C, HW)
            kernel = functools.partial(_bn_fused_kernel, inv_m=float(1.0 / M), eps=eps)
            y3, mean2, var2 = pl.pallas_call(
                kernel,
                out_shape=(jax.ShapeDtypeStruct((N, C, HW), x.dtype),
                           jax.ShapeDtypeStruct((C, 1), jnp.float32),
                           jax.ShapeDtypeStruct((C, 1), jnp.float32)),
                grid_spec=pltpu.PrefetchScalarGridSpec(
                    num_scalar_prefetch=0,
                    grid=(1,),
                    in_specs=[pl.BlockSpec((N, C, HW), lambda i: (0, 0, 0)),
                              pl.BlockSpec((C, 1), lambda i: (0, 0)),
                              pl.BlockSpec((C, 1), lambda i: (0, 0))],
                    out_specs=(pl.BlockSpec((N, C, HW), lambda i: (0, 0, 0)),
                               pl.BlockSpec((C, 1), lambda i: (0, 0)),
                               pl.BlockSpec((C, 1), lambda i: (0, 0))),
                ),
                compiler_params=pltpu.CompilerParams(
                    dimension_semantics=("arbitrary",),
                    vmem_limit_bytes=vmem_limit,
                ),
            )(x3, gamma_f.reshape(C, 1), beta_f.reshape(C, 1))
            y = y3.reshape(N, C, H, W)
            batch_mean = mean2.reshape(C)
            batch_var = var2.reshape(C)
        else:
            # Two-pass tiled path: row-partial stats (megacore-shardable) + apply.
            stats_budget = _stats_budget or min(vmem_limit // 4, 16 * 1024 * 1024)
            x2 = x.reshape(R, HW)
            rsum, rsq = _row_stats(x2, R, HW, stats_budget, vmem_limit)
            csum = rsum.reshape(N, C).sum(axis=0)
            csq = rsq.reshape(N, C).sum(axis=0)
            batch_mean = csum * (1.0 / M)
            batch_var = jnp.maximum(csq * (1.0 / M) - batch_mean * batch_mean, 0.0)

            scale = gamma_f * jax.lax.rsqrt(batch_var + eps)
            bias = beta_f - batch_mean * scale
            scale_rows = jnp.tile(scale, (N,)).reshape(R, 1)
            bias_rows = jnp.tile(bias, (N,)).reshape(R, 1)
            y2 = _apply_rows(x2, scale_rows, bias_rows, R, HW,
                             apply_budget, vmem_limit, x.dtype)
            y = y2.reshape(N, C, H, W)

        # Running-stats EMA (biased batch variance, matching the module's update).
        # TODO(synk): momentum=None (cumulative moving average) variant not implemented.
        new_rm = (1.0 - momentum) * running_mean + momentum * batch_mean
        new_rv = (1.0 - momentum) * running_var + momentum * batch_var
        return y, new_rm, new_rv

    # Eval mode: normalize with running stats (1 read + 1 write, already optimal).
    scale = gamma_f * jax.lax.rsqrt(running_var.astype(jnp.float32) + eps)
    bias = beta_f - running_mean.astype(jnp.float32) * scale
    x2 = x.reshape(R, HW)
    scale_rows = jnp.tile(scale, (N,)).reshape(R, 1)
    bias_rows = jnp.tile(bias, (N,)).reshape(R, 1)
    y2 = _apply_rows(x2, scale_rows, bias_rows, R, HW, apply_budget, vmem_limit, x.dtype)
    return y2.reshape(N, C, H, W), running_mean, running_var


# ---------------------------------------------------------------------------
# Pure-JAX reference + self-test
# ---------------------------------------------------------------------------

def _reference(x, gamma, beta, running_mean, running_var, eps, momentum, training):
    C = x.shape[1]
    g = gamma.reshape(1, C, 1, 1)
    b = beta.reshape(1, C, 1, 1)
    if training:
        m = jnp.mean(x, axis=(0, 2, 3))
        v = jnp.mean((x - m.reshape(1, C, 1, 1)) ** 2, axis=(0, 2, 3))
        y = g * (x - m.reshape(1, C, 1, 1)) / jnp.sqrt(v.reshape(1, C, 1, 1) + eps) + b
        rm = (1.0 - momentum) * running_mean + momentum * m
        rv = (1.0 - momentum) * running_var + momentum * v
        return y, rm, rv
    y = g * (x - running_mean.reshape(1, C, 1, 1)) / jnp.sqrt(
        running_var.reshape(1, C, 1, 1) + eps) + b
    return y, running_mean, running_var


if __name__ == "__main__":
    key = jax.random.PRNGKey(0)
    keys = jax.random.split(key, 4)

    def run_case(shape, seed_key, training=True, force_tiled=False,
                 stats_budget=None, apply_budget=None):
        N, C, H, W = shape
        k1, k2 = jax.random.split(seed_key)
        x = jax.random.normal(k1, shape, dtype=jnp.float32) * 2.0 + 0.5
        gamma = 1.0 + 0.1 * jax.random.normal(k2, (C,), dtype=jnp.float32)
        beta = 0.05 * jnp.arange(C, dtype=jnp.float32)
        rm = jnp.zeros((C,), jnp.float32)
        rv = jnp.ones((C,), jnp.float32)

        y, nrm, nrv = batchnorm2d_forward(
            x, gamma, beta, rm, rv, eps=1e-5, momentum=0.1, training=training,
            _force_tiled=force_tiled, _stats_budget=stats_budget,
            _apply_budget=apply_budget)
        jax.block_until_ready((y, nrm, nrv))

        y_ref, rm_ref, rv_ref = _reference(x, gamma, beta, rm, rv, 1e-5, 0.1, training)
        assert jnp.allclose(y, y_ref, atol=2e-4, rtol=2e-4), f"y mismatch {shape}"
        assert jnp.allclose(nrm, rm_ref, atol=1e-5, rtol=1e-5), f"running_mean mismatch {shape}"
        assert jnp.allclose(nrv, rv_ref, atol=2e-4, rtol=2e-4), f"running_var mismatch {shape}"

    # 1) Small activation -> fused single-kernel path (stats + normalize in one pass).
    run_case((2, 4, 16, 16), keys[0])
    # 2) Two-pass tiled path, HW not a multiple of 128 -> full-HW rows, row-tiled grid.
    run_case((3, 16, 24, 24), keys[1], force_tiled=True,
             stats_budget=64 * 1024, apply_budget=64 * 1024)
    # 3) Two-pass tiled path with lane tiling + cross-tile stats accumulation.
    run_case((2, 8, 32, 32), keys[2], force_tiled=True,
             stats_budget=16 * 1024, apply_budget=16 * 1024)
    # 4) Eval mode (normalize with running stats).
    run_case((2, 4, 16, 16), keys[3], training=False)

    print("KERNEL_OK")
</pallas_src>

<mosaic_0001>
module attributes {stable_mosaic.version = 11 : i64} {
  func.func @_bn_fused_kernel(%arg0: i32, %arg1: memref<2x4x256xf32, #tpu.memory_space<vmem>>, %arg2: memref<4x1xf32, #tpu.memory_space<vmem>>, %arg3: memref<4x1xf32, #tpu.memory_space<vmem>>, %arg4: memref<2x4x256xf32, #tpu.memory_space<vmem>>, %arg5: memref<4x1xf32, #tpu.memory_space<vmem>>, %arg6: memref<4x1xf32, #tpu.memory_space<vmem>>) attributes {dimension_semantics = [#tpu.dimension_semantics<arbitrary>], iteration_bounds = array<i64: 1>, scalar_prefetch = 0 : i64, scratch_operands = 0 : i64, tpu.core_type = #tpu.core_type<tc>, window_params = [{pipeline_mode = #tpu.pipeline_mode<synchronous>, transform_indices = @transform_0, window_bounds = array<i64: 2, 4, 256>}, {pipeline_mode = #tpu.pipeline_mode<synchronous>, transform_indices = @transform_1, window_bounds = array<i64: 4, 1>}, {pipeline_mode = #tpu.pipeline_mode<synchronous>, transform_indices = @transform_2, window_bounds = array<i64: 4, 1>}, {pipeline_mode = #tpu.pipeline_mode<synchronous>, transform_indices = @transform_3, window_bounds = array<i64: 2, 4, 256>}, {pipeline_mode = #tpu.pipeline_mode<synchronous>, transform_indices = @transform_4, window_bounds = array<i64: 4, 1>}, {pipeline_mode = #tpu.pipeline_mode<synchronous>, transform_indices = @transform_5, window_bounds = array<i64: 4, 1>}]} {
    %c0 = arith.constant 0 : index
    %c0_0 = arith.constant 0 : index
    %c0_1 = arith.constant 0 : index
    %0 = vector.load %arg1[%c0, %c0_0, %c0_1] : memref<2x4x256xf32, #tpu.memory_space<vmem>>, vector<2x4x256xf32>
    %cst = arith.constant dense<0.000000e+00> : vector<4x256xf32>
    %1 = vector.multi_reduction <add>, %0, %cst [0] : vector<2x4x256xf32> to vector<4x256xf32>
    %2 = arith.mulf %0, %0 : vector<2x4x256xf32>
    %cst_2 = arith.constant dense<0.000000e+00> : vector<4x256xf32>
    %3 = vector.multi_reduction <add>, %2, %cst_2 [0] : vector<2x4x256xf32> to vector<4x256xf32>
    %cst_3 = arith.constant dense<0.000000e+00> : vector<4xf32>
    %4 = vector.multi_reduction <add>, %1, %cst_3 [1] : vector<4x256xf32> to vector<4xf32>
    %5 = vector.shape_cast %4 : vector<4xf32> to vector<4x1xf32>
    %cst_4 = arith.constant dense<0.000000e+00> : vector<4xf32>
    %6 = vector.multi_reduction <add>, %3, %cst_4 [1] : vector<4x256xf32> to vector<4xf32>
    %7 = vector.shape_cast %6 : vector<4xf32> to vector<4x1xf32>
    %cst_5 = arith.constant 0.001953125 : f32
    %8 = vector.broadcast %cst_5 : f32 to vector<4x1xf32>
    %9 = arith.mulf %5, %8 : vector<4x1xf32>
    %cst_6 = arith.constant 0.001953125 : f32
    %10 = vector.broadcast %cst_6 : f32 to vector<4x1xf32>
    %11 = arith.mulf %7, %10 : vector<4x1xf32>
    %12 = arith.mulf %9, %9 : vector<4x1xf32>
    %13 = arith.subf %11, %12 : vector<4x1xf32>
    %cst_7 = arith.constant 0.000000e+00 : f32
    %14 = vector.broadcast %cst_7 : f32 to vector<4x1xf32>
    %15 = arith.maximumf %13, %14 : vector<4x1xf32>
    %c0_8 = arith.constant 0 : index
    %c0_9 = arith.constant 0 : index
    %16 = vector.load %arg2[%c0_8, %c0_9] : memref<4x1xf32, #tpu.memory_space<vmem>>, vector<4x1xf32>
    %cst_10 = arith.constant 9.99999974E-6 : f32
    %17 = vector.broadcast %cst_10 : f32 to vector<4x1xf32>
    %18 = arith.addf %15, %17 : vector<4x1xf32>
    %19 = math.rsqrt %18 : vector<4x1xf32>
    %20 = arith.mulf %16, %19 : vector<4x1xf32>
    %c0_11 = arith.constant 0 : index
    %c0_12 = arith.constant 0 : index
    %21 = vector.load %arg3[%c0_11, %c0_12] : memref<4x1xf32, #tpu.memory_space<vmem>>, vector<4x1xf32>
    %22 = arith.mulf %9, %20 : vector<4x1xf32>
    %23 = arith.subf %21, %22 : vector<4x1xf32>
    %24 = vector.shape_cast %20 : vector<4x1xf32> to vector<1x4x1xf32>
    %25 = vector.broadcast %24 : vector<1x4x1xf32> to vector<2x4x256xf32>
    %26 = arith.mulf %0, %25 : vector<2x4x256xf32>
    %27 = vector.shape_cast %23 : vector<4x1xf32> to vector<1x4x1xf32>
    %28 = vector.broadcast %27 : vector<1x4x1xf32> to vector<2x4x256xf32>
    %29 = arith.addf %26, %28 : vector<2x4x256xf32>
    %c0_13 = arith.constant 0 : index
    %c0_14 = arith.constant 0 : index
    %c0_15 = arith.constant 0 : index
    %30 = vector.load %arg4[%c0_13, %c0_14, %c0_15] : memref<2x4x256xf32, #tpu.memory_space<vmem>>, vector<2x4x256xf32>
    tpu.vector_store %arg4[%c0_13, %c0_14, %c0_15], %29 {strides = array<i32>} : memref<2x4x256xf32, #tpu.memory_space<vmem>>, vector<2x4x256xf32>,
    %c0_16 = arith.constant 0 : index
    %c0_17 = arith.constant 0 : index
    %31 = vector.load %arg5[%c0_16, %c0_17] : memref<4x1xf32, #tpu.memory_space<vmem>>, vector<4x1xf32>
    tpu.vector_store %arg5[%c0_16, %c0_17], %9 {strides = array<i32>} : memref<4x1xf32, #tpu.memory_space<vmem>>, vector<4x1xf32>,
    %c0_18 = arith.constant 0 : index
    %c0_19 = arith.constant 0 : index
    %32 = vector.load %arg6[%c0_18, %c0_19] : memref<4x1xf32, #tpu.memory_space<vmem>>, vector<4x1xf32>
    tpu.vector_store %arg6[%c0_18, %c0_19], %15 {strides = array<i32>} : memref<4x1xf32, #tpu.memory_space<vmem>>, vector<4x1xf32>,
    return
  }
  func.func @transform_0(%arg0: i32) -> (i32, i32, i32) {
    %c0_i32 = arith.constant 0 : i32
    %c0_i32_0 = arith.constant 0 : i32
    %c0_i32_1 = arith.constant 0 : i32
    %c0_i32_2 = arith.constant 0 : i32
    return %c0_i32, %c0_i32_0, %c0_i32_1 : i32, i32, i32
  }
  func.func @transform_1(%arg0: i32) -> (i32, i32) {
    %c0_i32 = arith.constant 0 : i32
    %c0_i32_0 = arith.constant 0 : i32
    %c0_i32_1 = arith.constant 0 : i32
    return %c0_i32, %c0_i32_0 : i32, i32
  }
  func.func @transform_2(%arg0: i32) -> (i32, i32) {
    %c0_i32 = arith.constant 0 : i32
    %c0_i32_0 = arith.constant 0 : i32
    %c0_i32_1 = arith.constant 0 : i32
    return %c0_i32, %c0_i32_0 : i32, i32
  }
  func.func @transform_3(%arg0: i32) -> (i32, i32, i32) {
    %c0_i32 = arith.constant 0 : i32
    %c0_i32_0 = arith.constant 0 : i32
    %c0_i32_1 = arith.constant 0 : i32
    %c0_i32_2 = arith.constant 0 : i32
    return %c0_i32, %c0_i32_0, %c0_i32_1 : i32, i32, i32
  }
  func.func @transform_4(%arg0: i32) -> (i32, i32) {
    %c0_i32 = arith.constant 0 : i32
    %c0_i32_0 = arith.constant 0 : i32
    %c0_i32_1 = arith.constant 0 : i32
    return %c0_i32, %c0_i32_0 : i32, i32
  }
  func.func @transform_5(%arg0: i32) -> (i32, i32) {
    %c0_i32 = arith.constant 0 : i32
    %c0_i32_0 = arith.constant 0 : i32
    %c0_i32_1 = arith.constant 0 : i32
    return %c0_i32, %c0_i32_0 : i32, i32
  }
}

</mosaic_0001>

<bundles_post_ra>
// kernel: tpu_custom_call.1
= control target key start
LH: loop header
LB: loop body
LE: loop exit
PB: predicated region body
PF: predicated region fallthrough
CT: control target
= control target key end

     0   :  { %11 = vsyncpa [#allocation3], 0  ;;  %s291_s0 = inlined_call_operand.hbm [shape: f32[2,4,256], index: 0, kind: input, shape index: {}]   ;;  %s292_s1 = inlined_call_operand.vmem [shape: f32[4,1], index: 1, kind: input, shape index: {}]   ;;  %s293_s2 = inlined_call_operand.vmem [shape: f32[4,1], index: 2, kind: input, shape index: {}]   ;;  %s294_s3 = inlined_call_operand.hbm [shape: f32[2,4,256], index: 3, kind: output, shape index: {0}]   ;;  %s295_s4 = inlined_call_operand.vmem [shape: f32[4,1], index: 4, kind: output, shape index: {1}]   ;;  %s296_s5 = inlined_call_operand.vmem [shape: f32[4,1], index: 5, kind: output, shape index: {2}]  }
   0x1   :  { %12 = vsyncpa [#allocation4], 0  ;;  %s201_s18 = smov [#allocation2]   ;;  %s153_s22 = scalar_lea.hbm %s291_s0, 256 }
   0x2   :  { %s18_s19 = sshll.u32 %s201_s18, 4  ;;  %p154_p0 = scmp.ne.s32.totalorder %s291_s0, %s153_s22  ;;  %s19_s19 = int_to_ptr.vmem [resolvable:$true] %s18_s19 }
   0x3   :  { %p157_p1 = scmp.lt.u32.totalorder %s153_s22, %s291_s0 }
   0x5   :  { %p159_p2 = pnand %p157_p1, %p154_p0 }
   0x7   :  { %162 = shalt.err (!%p159_p2)
}
   0x8   :  { %s163_s27 = scalar_lea.vmem %s19_s19, 256  ;;  %p168_p4 = scmp.lt.s32.totalorder %s19_s19, %s19_s19 }
   0x9   :  { %p164_p3 = scmp.ne.s32.totalorder %s19_s19, %s163_s27  ;;  %p169_p5 = scmp.lt.s32.totalorder %s163_s27, %s163_s27 }
   0xb   :  { %p170_p6 = por %p169_p5, %p168_p4 }
   0xd   :  { %p171_p7 = pnand %p170_p6, %p164_p3 }
   0xf   :  { %174 = shalt.err (!%p171_p7)
}
  0x10   :  { %s202_s28 = smov 128   ;;  %s203_s29 = smov 8  }
  0x11   :  { %24 = dma.hbm_to_vmem [thread:$0]  %s291_s0, 256, %s19_s19, [#allocation3], %s202_s28, %s202_s28, %s203_s29  }
  0x12   :  { %197 = dma.done.wait [#allocation3], 256  }
  0x13   :  { %198 = vsyncadd [#allocation3], 4294967040  ;;  %vm40_vm0 = vcmask 1043456   ;;  %v32_v0 = vld [vmem:[#allocation2] sm:$0xff]  ;;  %v33_v1 = vld [vmem:[#allocation2 + $0x8] sm:$0xff]  ;;  %v204_v26 = vmov 0   ;;  %v90_v43 = vlaneseq }
  0x14   :  { %v36_v2 = vcombine.high %v32_v0, %v32_v0  ;;  %v37_v3 = vcombine.high %v33_v1, %v33_v1  ;;  %v41_v4 = vsel %vm40_vm0, %v32_v0, 0.0  ;;  %v42_v5 = vsel %vm40_vm0, %v33_v1, 0.0  ;;  %147 = vset.pattern.permute.xlu1 %v204_v26  ;;  %148 = vset.pattern.permute.xlu0 %v204_v26  ;;  %v76_v35 = vld [vmem:[%s292_s1] sm:$0xf]  ;;  %s206_s1 = smov [#allocation5]  }
  0x15   :  { %v43_v6 = vadd.f32 %v42_v5, %v41_v4  ;;  %v47_v7 = vmul.f32 %v32_v0, %v32_v0  ;;  %v48_v8 = vmul.f32 %v33_v1, %v33_v1  ;;  %vm113_vm1 = vcmask 3072   ;;  %v80_v38 = vld [vmem:[%s293_s2] sm:$0xf] }
  0x16   :  { %v44_v9 = vsel %vm40_vm0, %v36_v2, 0.0  ;;  %v45_v10 = vsel %vm40_vm0, %v37_v3, 0.0  ;;  %v205_v41 = vmov 839922192   ;;  %v91_v45 = vshrl.u32 %v90_v43, 7 }
  0x17   :  { %v46_v11 = vadd.f32 %v45_v10, %v44_v9  ;;  %v61_v12 = vsel %vm40_vm0, %v43_v6, 0.0  ;;  %v51_v13 = vcombine.high %v47_v7, %v47_v7  ;;  %v52_v14 = vcombine.high %v48_v8, %v48_v8 }
  0x18   :  { %v55_v15 = vsel %vm40_vm0, %v47_v7, 0.0  ;;  %v56_v16 = vsel %vm40_vm0, %v48_v8, 0.0  ;;  %v88_v42 = vunpack.c.l.s4 %v205_v41 }
  0x19   :  { %v62_v17 = vsel %vm40_vm0, %v46_v11, 0.0  ;;  %v57_v18 = vadd.f32 %v56_v16, %v55_v15  ;;  %v58_v19 = vsel %vm40_vm0, %v51_v13, 0.0  ;;  %v59_v20 = vsel %vm40_vm0, %v52_v14, 0.0 }
  0x1a   :  { %v63_v21 = vadd.f32 %v62_v17, %v61_v12  ;;  %v60_v22 = vadd.f32 %v59_v20, %v58_v19  ;;  %v89_v44 = vunpack.c.0.s8 %v88_v42 }
  0x1b   :  { %v66_v23 = vsel %vm40_vm0, %v57_v18, 0.0 }
  0x1c   :  { %64 = vadd.xlane.f32.xlu0 %v63_v21  ;;  %v67_v24 = vsel %vm40_vm0, %v60_v22, 0.0  ;;  %v92_v46 = vsub.s32 %v89_v44, %v91_v45 }
  0x1d   :  { %v68_v25 = vadd.f32 %v67_v24, %v66_v23 }
  0x20   :  { %69 = vadd.xlane.f32.xlu0 %v68_v25 }
  0xa9   :  { %v65_v27 = vpop.xlane.xlu0 %64 }
  0xaa   :  { %v71_v28 = vmul.f32 0.001953125, %v65_v27 }
  0xac   :  { %114 = vst.msk [vmem:[%s295_s4] sm:$0xf] %vm113_vm1, %v71_v28  ;;  %v73_v30 = vmul.f32 %v71_v28, %v71_v28  ;;  %s121_s4 = sshll.u32 %s206_s1, 4  ;;  %s122_s4 = int_to_ptr.vmem [resolvable:$true] %s121_s4 }
  0xad   :  { %v70_v29 = vpop.xlane.xlu0 %69  ;;  %s175_s2 = scalar_lea.vmem %s122_s4, 256  ;;  %p180_p9 = scmp.lt.s32.totalorder %s122_s4, %s122_s4 }
  0xae   :  { %v72_v31 = vmul.f32 0.001953125, %v70_v29  ;;  %p176_p8 = scmp.ne.s32.totalorder %s122_s4, %s175_s2  ;;  %p181_p10 = scmp.lt.s32.totalorder %s175_s2, %s175_s2 }
  0xb0   :  { %v74_v32 = vsub.f32 %v72_v31, %v73_v30  ;;  %p182_p11 = por %p181_p10, %p180_p9 }
  0xb2   :  { %v75_v33 = vmax.f32 %v74_v32, 0.0  ;;  %p183_p12 = pnand %p182_p11, %p176_p8 }
  0xb4   :  { %v77_v34 = vadd.f32 1e-05, %v75_v33  ;;  %115 = vst.msk [vmem:[%s296_s5] sm:$0xf] %vm113_vm1, %v75_v33 }
  0xb6   :  { %151 = vrsqrt.f32 %v77_v34 }
  0xc0   :  { %v152_v36 = vpop.eup %151 }
  0xc1   :  { %v79_v37 = vmul.f32 %v152_v36, %v76_v35 }
  0xc3   :  { %85 = vperm.xlu1 %147, %v79_v37   ;;  %v81_v39 = vmul.f32 %v79_v37, %v71_v28 }
  0xc5   :  { %v82_v40 = vsub.f32 %v80_v38, %v81_v39 }
  0xc7   :  { %99 = vperm.xlu1 %147, %v82_v40  }
 0x142   :  { %v86_v47 = vpop.permute.xlu1 %85 }
 0x143   :  { %v93_v48 = vrot.slane %v86_v47, %v92_v46 }
 0x145   :  { %v95_v50 = vmul.f32 %v93_v48, %v32_v0  ;;  %v96_v51 = vmul.f32 %v93_v48, %v33_v1 }
 0x146   :  { %v100_v49 = vpop.permute.xlu1 %99 }
 0x147   :  { %v107_v52 = vrot.slane %v100_v49, %v92_v46 }
 0x149   :  { %v109_v53 = vadd.f32 %v107_v52, %v95_v50  ;;  %v110_v54 = vadd.f32 %v107_v52, %v96_v51 }
 0x14b   :  { %111 = vst [vmem:[#allocation5] sm:$0xff] %v109_v53  ;;  %112 = vst [vmem:[#allocation5 + $0x8] sm:$0xff] %v110_v54 }
 0x14c   :  { %186 = shalt.err (!%p183_p12)
}
 0x14d   :  { %s187_s15 = scalar_lea.hbm %s294_s3, 256 }
 0x14e   :  { %p188_p13 = scmp.ne.s32.totalorder %s294_s3, %s187_s15  ;;  %p191_p0 = scmp.lt.u32.totalorder %s187_s15, %s294_s3 }
 0x150   :  { %p193_p1 = pnand %p191_p0, %p188_p13 }
 0x152   :  { %196 = shalt.err (!%p193_p1)
}
 0x153   :  { %127 = dma.vmem_to_hbm [thread:$0]  %s122_s4, 256, %s294_s3, [#allocation4], %s202_s28, %s202_s28, %s203_s29  }
 0x154   :  { %199 = dma.done.wait [#allocation4], 256  }
 0x155   :  { %200 = vsyncadd [#allocation4], 4294967040 }
 0x156   :  { %139 = vsyncpa [#allocation3], 1 }
 0x157   :  { %140 = vsyncpa [#allocation4], 1 }

</bundles_post_ra>
